<compile_context>
chip_gen: v7x
topology: tpu7x:2x2x1
jax: 0.10.0
libtpu: 0.0.40
codegen_flags: <defaults>
</compile_context>

<pallas_src>
import functools

import jax
import jax.numpy as jnp
from jax.experimental import pallas as pl
from jax.experimental.pallas import tpu as pltpu

DIMS = [23, 128, 256, 256, 128, 1]


def _round_up(n, m):
    return ((n + m - 1) // m) * m


def mlp_kernel(x_ref,
               w1_ref, b1_ref,
               w2_ref, b2_ref,
               w3_ref, b3_ref,
               w4_ref, b4_ref,
               w5_ref, b5_ref,
               o_ref):
    """One batch tile of the fused MLP forward."""
    x = x_ref[...]                                   # (TB, 23) bf16

    # fc1..fc4: bf16 MXU matmuls, f32 accumulate, f32 bias+ReLU, recast to bf16.
    h = jnp.dot(x, w1_ref[...], preferred_element_type=jnp.float32) + b1_ref[...]
    h = jnp.maximum(h, 0.0).astype(jnp.bfloat16)

    h = jnp.dot(h, w2_ref[...], preferred_element_type=jnp.float32) + b2_ref[...]
    h = jnp.maximum(h, 0.0).astype(jnp.bfloat16)

    h = jnp.dot(h, w3_ref[...], preferred_element_type=jnp.float32) + b3_ref[...]
    h = jnp.maximum(h, 0.0).astype(jnp.bfloat16)

    h = jnp.dot(h, w4_ref[...], preferred_element_type=jnp.float32) + b4_ref[...]
    h = jnp.maximum(h, 0.0)                          # keep f32 for the VPU tail

    # fc5: (TB,128) @ (128,1) as elementwise multiply + lane reduce (VPU/XLU),
    # avoiding a 1-lane-wide MXU matmul / drain.
    out = jnp.sum(h * w5_ref[...], axis=-1, keepdims=True) + b5_ref[...]
    o_ref[...] = out.astype(o_ref.dtype)


def mlp_forward(x, params, *, block_b=512):
    """x: (B, 23) float32.  params: list of (W (in,out) f32, b (1,out) f32)."""
    B, F = x.shape
    assert F == DIMS[0], (B, F)
    (w1, b1), (w2, b2), (w3, b3), (w4, b4), (w5, b5) = params

    # Batch tile: multiple of 8 (sublane), no bigger than the (padded) batch.
    block_b = _round_up(max(block_b, 8), 8)
    tb = min(block_b, _round_up(B, 8))
    b_pad = _round_up(B, tb)
    if b_pad != B:
        x = jnp.pad(x, ((0, b_pad - B), (0, 0)))

    # Operand dtypes: bf16 activations/weights for the MXU, f32 biases, f32 fc5 row.
    x_bf = x.astype(jnp.bfloat16)
    w1b, w2b, w3b, w4b = (w.astype(jnp.bfloat16) for w in (w1, w2, w3, w4))
    w5_row = jnp.reshape(w5, (1, DIMS[4])).astype(jnp.float32)   # (1, 128)
    b5_s = jnp.reshape(b5, (1, 1)).astype(jnp.float32)

    grid = (b_pad // tb,)
    x_spec = pl.BlockSpec((tb, F), lambda i: (i, 0))
    res = lambda shape: pl.BlockSpec(shape, lambda i: (0, 0))    # VMEM-resident operand
    in_specs = [
        x_spec,
        res(w1b.shape), res(b1.shape),
        res(w2b.shape), res(b2.shape),
        res(w3b.shape), res(b3.shape),
        res(w4b.shape), res(b4.shape),
        res(w5_row.shape), res(b5_s.shape),
    ]
    out_spec = pl.BlockSpec((tb, 1), lambda i: (i, 0))

    # Advisory cost estimate so XLA does not treat the call as zero-cost.
    flops_per_row = 2 * sum(DIMS[i] * DIMS[i + 1] for i in range(len(DIMS) - 1))
    weight_bytes = sum(w.size * w.dtype.itemsize for w in
                       (w1b, w2b, w3b, w4b, w5_row, b1, b2, b3, b4, b5_s))
    cost = pl.CostEstimate(
        flops=flops_per_row * b_pad,
        transcendentals=0,
        bytes_accessed=x_bf.size * 2 + b_pad * 4 + weight_bytes,
    )

    out = pl.pallas_call(
        mlp_kernel,
        out_shape=jax.ShapeDtypeStruct((b_pad, 1), jnp.float32),
        grid=grid,
        in_specs=in_specs,
        out_specs=out_spec,
        compiler_params=pltpu.CompilerParams(
            dimension_semantics=("parallel",),
            vmem_limit_bytes=32 << 20,
        ),
        cost_estimate=cost,
    )(x_bf, w1b, b1, w2b, b2, w3b, b3, w4b, b4, w5_row, b5_s)

    return out[:B]


def init_params(key):
    """Deterministic init mimicking PyTorch Linear (bound = 1/sqrt(fan_in)).

    W is stored as (in, out) so each layer is y = x @ W + b (== x @ W_pt.T)."""
    params = []
    for i in range(len(DIMS) - 1):
        fan_in, fan_out = DIMS[i], DIMS[i + 1]
        key, kw, kb = jax.random.split(key, 3)
        bound = 1.0 / jnp.sqrt(float(fan_in))
        W = jax.random.uniform(kw, (fan_in, fan_out), jnp.float32, -bound, bound)
        b = jax.random.uniform(kb, (1, fan_out), jnp.float32, -bound, bound)
        params.append((W, b))
    return params


def mlp_reference_f32(x, params):
    """Plain f32 reference (PyTorch semantics)."""
    h = x
    for i, (W, b) in enumerate(params):
        h = h @ W + b
        if i < len(params) - 1:
            h = jnp.maximum(h, 0.0)
    return h


def mlp_reference_mixed(x, params):
    """Reference matching the kernel's mixed-precision arithmetic exactly."""
    (w1, b1), (w2, b2), (w3, b3), (w4, b4), (w5, b5) = params
    h = x.astype(jnp.bfloat16)
    for (W, b) in ((w1, b1), (w2, b2), (w3, b3)):
        h = jnp.dot(h, W.astype(jnp.bfloat16), preferred_element_type=jnp.float32) + b
        h = jnp.maximum(h, 0.0).astype(jnp.bfloat16)
    h = jnp.dot(h, w4.astype(jnp.bfloat16), preferred_element_type=jnp.float32) + b4
    h = jnp.maximum(h, 0.0)
    w5_row = jnp.reshape(w5, (1, -1)).astype(jnp.float32)
    return jnp.sum(h * w5_row, axis=-1, keepdims=True) + jnp.reshape(b5, (1, 1))


if __name__ == "__main__":
    key = jax.random.PRNGKey(0)
    key, kx = jax.random.split(key)

    B = 200                      # not a multiple of the tile -> exercises padding path
    x = jax.random.normal(kx, (B, DIMS[0]), jnp.float32)
    params = init_params(key)

    out = mlp_forward(x, params, block_b=64)   # small tile for the demo (default 512)
    out = jax.block_until_ready(out)
    assert out.shape == (B, 1), out.shape

    ref_mixed = mlp_reference_mixed(x, params)
    assert jnp.allclose(out, ref_mixed, atol=1e-3, rtol=1e-3), (
        f"mixed-precision mismatch: max abs err {jnp.max(jnp.abs(out - ref_mixed))}")

    ref_f32 = mlp_reference_f32(x, params)
    assert jnp.allclose(out, ref_f32, atol=5e-2, rtol=5e-2), (
        f"f32 reference mismatch: max abs err {jnp.max(jnp.abs(out - ref_f32))}")

    print("KERNEL_OK")
</pallas_src>

<mosaic_0001>
module attributes {stable_mosaic.version = 11 : i64} {
  func.func @mlp_kernel(%arg0: i32, %arg1: memref<64x23xbf16, #tpu.memory_space<vmem>>, %arg2: memref<23x128xbf16, #tpu.memory_space<vmem>>, %arg3: memref<1x128xf32, #tpu.memory_space<vmem>>, %arg4: memref<128x256xbf16, #tpu.memory_space<vmem>>, %arg5: memref<1x256xf32, #tpu.memory_space<vmem>>, %arg6: memref<256x256xbf16, #tpu.memory_space<vmem>>, %arg7: memref<1x256xf32, #tpu.memory_space<vmem>>, %arg8: memref<256x128xbf16, #tpu.memory_space<vmem>>, %arg9: memref<1x128xf32, #tpu.memory_space<vmem>>, %arg10: memref<1x128xf32, #tpu.memory_space<vmem>>, %arg11: memref<1x1xf32, #tpu.memory_space<vmem>>, %arg12: memref<64x1xf32, #tpu.memory_space<vmem>>) attributes {dimension_semantics = [#tpu.dimension_semantics<parallel>], iteration_bounds = array<i64: 4>, scalar_prefetch = 0 : i64, scratch_operands = 0 : i64, tpu.core_type = #tpu.core_type<tc>, window_params = [{transform_indices = @transform_0, window_bounds = array<i64: 64, 23>}, {pipeline_mode = #tpu.pipeline_mode<synchronous>, transform_indices = @transform_1, window_bounds = array<i64: 23, 128>}, {pipeline_mode = #tpu.pipeline_mode<synchronous>, transform_indices = @transform_2, window_bounds = array<i64: 1, 128>}, {pipeline_mode = #tpu.pipeline_mode<synchronous>, transform_indices = @transform_3, window_bounds = array<i64: 128, 256>}, {pipeline_mode = #tpu.pipeline_mode<synchronous>, transform_indices = @transform_4, window_bounds = array<i64: 1, 256>}, {pipeline_mode = #tpu.pipeline_mode<synchronous>, transform_indices = @transform_5, window_bounds = array<i64: 256, 256>}, {pipeline_mode = #tpu.pipeline_mode<synchronous>, transform_indices = @transform_6, window_bounds = array<i64: 1, 256>}, {pipeline_mode = #tpu.pipeline_mode<synchronous>, transform_indices = @transform_7, window_bounds = array<i64: 256, 128>}, {pipeline_mode = #tpu.pipeline_mode<synchronous>, transform_indices = @transform_8, window_bounds = array<i64: 1, 128>}, {pipeline_mode = #tpu.pipeline_mode<synchronous>, transform_indices = @transform_9, window_bounds = array<i64: 1, 128>}, {pipeline_mode = #tpu.pipeline_mode<synchronous>, transform_indices = @transform_10, window_bounds = array<i64: 1, 1>}, {transform_indices = @transform_11, window_bounds = array<i64: 64, 1>}]} {
    %c0 = arith.constant 0 : index
    %c0_0 = arith.constant 0 : index
    %0 = vector.load %arg1[%c0, %c0_0] : memref<64x23xbf16, #tpu.memory_space<vmem>>, vector<64x23xbf16>
    %c0_1 = arith.constant 0 : index
    %c0_2 = arith.constant 0 : index
    %1 = vector.load %arg2[%c0_1, %c0_2] : memref<23x128xbf16, #tpu.memory_space<vmem>>, vector<23x128xbf16>
    %cst = arith.constant dense<0.000000e+00> : vector<64x128xf32>
    %2 = tpu.matmul %0, %1, %cst {dimension_numbers = #tpu.dot_dimension_numbers<[1], [0], [0], [1], [0, 0, 1, 1], [], []>} : vector<64x23xbf16>, vector<23x128xbf16>, vector<64x128xf32> -> vector<64x128xf32>
    %c0_3 = arith.constant 0 : index
    %c0_4 = arith.constant 0 : index
    %3 = vector.load %arg3[%c0_3, %c0_4] : memref<1x128xf32, #tpu.memory_space<vmem>>, vector<1x128xf32>
    %4 = vector.broadcast %3 : vector<1x128xf32> to vector<64x128xf32>
    %5 = arith.addf %2, %4 : vector<64x128xf32>
    %cst_5 = arith.constant 0.000000e+00 : f32
    %6 = vector.broadcast %cst_5 : f32 to vector<64x128xf32>
    %7 = arith.maximumf %5, %6 : vector<64x128xf32>
    %8 = arith.truncf %7 : vector<64x128xf32> to vector<64x128xbf16>
    %c0_6 = arith.constant 0 : index
    %c0_7 = arith.constant 0 : index
    %9 = vector.load %arg4[%c0_6, %c0_7] : memref<128x256xbf16, #tpu.memory_space<vmem>>, vector<128x256xbf16>
    %cst_8 = arith.constant dense<0.000000e+00> : vector<64x256xf32>
    %10 = tpu.matmul %8, %9, %cst_8 {dimension_numbers = #tpu.dot_dimension_numbers<[1], [0], [0], [1], [0, 0, 1, 1], [], []>} : vector<64x128xbf16>, vector<128x256xbf16>, vector<64x256xf32> -> vector<64x256xf32>
    %c0_9 = arith.constant 0 : index
    %c0_10 = arith.constant 0 : index
    %11 = vector.load %arg5[%c0_9, %c0_10] : memref<1x256xf32, #tpu.memory_space<vmem>>, vector<1x256xf32>
    %12 = vector.broadcast %11 : vector<1x256xf32> to vector<64x256xf32>
    %13 = arith.addf %10, %12 : vector<64x256xf32>
    %cst_11 = arith.constant 0.000000e+00 : f32
    %14 = vector.broadcast %cst_11 : f32 to vector<64x256xf32>
    %15 = arith.maximumf %13, %14 : vector<64x256xf32>
    %16 = arith.truncf %15 : vector<64x256xf32> to vector<64x256xbf16>
    %c0_12 = arith.constant 0 : index
    %c0_13 = arith.constant 0 : index
    %17 = vector.load %arg6[%c0_12, %c0_13] : memref<256x256xbf16, #tpu.memory_space<vmem>>, vector<256x256xbf16>
    %cst_14 = arith.constant dense<0.000000e+00> : vector<64x256xf32>
    %18 = tpu.matmul %16, %17, %cst_14 {dimension_numbers = #tpu.dot_dimension_numbers<[1], [0], [0], [1], [0, 0, 1, 1], [], []>} : vector<64x256xbf16>, vector<256x256xbf16>, vector<64x256xf32> -> vector<64x256xf32>
    %c0_15 = arith.constant 0 : index
    %c0_16 = arith.constant 0 : index
    %19 = vector.load %arg7[%c0_15, %c0_16] : memref<1x256xf32, #tpu.memory_space<vmem>>, vector<1x256xf32>
    %20 = vector.broadcast %19 : vector<1x256xf32> to vector<64x256xf32>
    %21 = arith.addf %18, %20 : vector<64x256xf32>
    %cst_17 = arith.constant 0.000000e+00 : f32
    %22 = vector.broadcast %cst_17 : f32 to vector<64x256xf32>
    %23 = arith.maximumf %21, %22 : vector<64x256xf32>
    %24 = arith.truncf %23 : vector<64x256xf32> to vector<64x256xbf16>
    %c0_18 = arith.constant 0 : index
    %c0_19 = arith.constant 0 : index
    %25 = vector.load %arg8[%c0_18, %c0_19] : memref<256x128xbf16, #tpu.memory_space<vmem>>, vector<256x128xbf16>
    %cst_20 = arith.constant dense<0.000000e+00> : vector<64x128xf32>
    %26 = tpu.matmul %24, %25, %cst_20 {dimension_numbers = #tpu.dot_dimension_numbers<[1], [0], [0], [1], [0, 0, 1, 1], [], []>} : vector<64x256xbf16>, vector<256x128xbf16>, vector<64x128xf32> -> vector<64x128xf32>
    %c0_21 = arith.constant 0 : index
    %c0_22 = arith.constant 0 : index
    %27 = vector.load %arg9[%c0_21, %c0_22] : memref<1x128xf32, #tpu.memory_space<vmem>>, vector<1x128xf32>
    %28 = vector.broadcast %27 : vector<1x128xf32> to vector<64x128xf32>
    %29 = arith.addf %26, %28 : vector<64x128xf32>
    %cst_23 = arith.constant 0.000000e+00 : f32
    %30 = vector.broadcast %cst_23 : f32 to vector<64x128xf32>
    %31 = arith.maximumf %29, %30 : vector<64x128xf32>
    %c0_24 = arith.constant 0 : index
    %c0_25 = arith.constant 0 : index
    %32 = vector.load %arg10[%c0_24, %c0_25] : memref<1x128xf32, #tpu.memory_space<vmem>>, vector<1x128xf32>
    %33 = vector.broadcast %32 : vector<1x128xf32> to vector<64x128xf32>
    %34 = arith.mulf %31, %33 : vector<64x128xf32>
    %cst_26 = arith.constant dense<0.000000e+00> : vector<64xf32>
    %35 = vector.multi_reduction <add>, %34, %cst_26 [1] : vector<64x128xf32> to vector<64xf32>
    %36 = vector.shape_cast %35 : vector<64xf32> to vector<64x1xf32>
    %c0_27 = arith.constant 0 : index
    %c0_28 = arith.constant 0 : index
    %37 = vector.load %arg11[%c0_27, %c0_28] : memref<1x1xf32, #tpu.memory_space<vmem>>, vector<1x1xf32>
    %38 = vector.broadcast %37 : vector<1x1xf32> to vector<64x1xf32>
    %39 = arith.addf %36, %38 : vector<64x1xf32>
    %c0_29 = arith.constant 0 : index
    %c0_30 = arith.constant 0 : index
    %40 = vector.load %arg12[%c0_29, %c0_30] : memref<64x1xf32, #tpu.memory_space<vmem>>, vector<64x1xf32>
    tpu.vector_store %arg12[%c0_29, %c0_30], %39 {strides = array<i32>} : memref<64x1xf32, #tpu.memory_space<vmem>>, vector<64x1xf32>,
    return
  }
  func.func @transform_0(%arg0: i32) -> (i32, i32) {
    %c0_i32 = arith.constant 0 : i32
    %c0_i32_0 = arith.constant 0 : i32
    return %arg0, %c0_i32 : i32, i32
  }
  func.func @transform_1(%arg0: i32) -> (i32, i32) {
    %c0_i32 = arith.constant 0 : i32
    %c0_i32_0 = arith.constant 0 : i32
    %c0_i32_1 = arith.constant 0 : i32
    return %c0_i32, %c0_i32_0 : i32, i32
  }
  func.func @transform_2(%arg0: i32) -> (i32, i32) {
    %c0_i32 = arith.constant 0 : i32
    %c0_i32_0 = arith.constant 0 : i32
    %c0_i32_1 = arith.constant 0 : i32
    return %c0_i32, %c0_i32_0 : i32, i32
  }
  func.func @transform_3(%arg0: i32) -> (i32, i32) {
    %c0_i32 = arith.constant 0 : i32
    %c0_i32_0 = arith.constant 0 : i32
    %c0_i32_1 = arith.constant 0 : i32
    return %c0_i32, %c0_i32_0 : i32, i32
  }
  func.func @transform_4(%arg0: i32) -> (i32, i32) {
    %c0_i32 = arith.constant 0 : i32
    %c0_i32_0 = arith.constant 0 : i32
    %c0_i32_1 = arith.constant 0 : i32
    return %c0_i32, %c0_i32_0 : i32, i32
  }
  func.func @transform_5(%arg0: i32) -> (i32, i32) {
    %c0_i32 = arith.constant 0 : i32
    %c0_i32_0 = arith.constant 0 : i32
    %c0_i32_1 = arith.constant 0 : i32
    return %c0_i32, %c0_i32_0 : i32, i32
  }
  func.func @transform_6(%arg0: i32) -> (i32, i32) {
    %c0_i32 = arith.constant 0 : i32
    %c0_i32_0 = arith.constant 0 : i32
    %c0_i32_1 = arith.constant 0 : i32
    return %c0_i32, %c0_i32_0 : i32, i32
  }
  func.func @transform_7(%arg0: i32) -> (i32, i32) {
    %c0_i32 = arith.constant 0 : i32
    %c0_i32_0 = arith.constant 0 : i32
    %c0_i32_1 = arith.constant 0 : i32
    return %c0_i32, %c0_i32_0 : i32, i32
  }
  func.func @transform_8(%arg0: i32) -> (i32, i32) {
    %c0_i32 = arith.constant 0 : i32
    %c0_i32_0 = arith.constant 0 : i32
    %c0_i32_1 = arith.constant 0 : i32
    return %c0_i32, %c0_i32_0 : i32, i32
  }
  func.func @transform_9(%arg0: i32) -> (i32, i32) {
    %c0_i32 = arith.constant 0 : i32
    %c0_i32_0 = arith.constant 0 : i32
    %c0_i32_1 = arith.constant 0 : i32
    return %c0_i32, %c0_i32_0 : i32, i32
  }
  func.func @transform_10(%arg0: i32) -> (i32, i32) {
    %c0_i32 = arith.constant 0 : i32
    %c0_i32_0 = arith.constant 0 : i32
    %c0_i32_1 = arith.constant 0 : i32
    return %c0_i32, %c0_i32_0 : i32, i32
  }
  func.func @transform_11(%arg0: i32) -> (i32, i32) {
    %c0_i32 = arith.constant 0 : i32
    %c0_i32_0 = arith.constant 0 : i32
    return %arg0, %c0_i32 : i32, i32
  }
}

</mosaic_0001>

<bundles_post_ra>
// kernel: tpu_custom_call.1
= control target key start
LH: loop header
LB: loop body
LE: loop exit
PB: predicated region body
PF: predicated region fallthrough
CT: control target
= control target key end

     0   :  { %s2034_s0 = inlined_call_operand.vmem [shape: bf16[256,23], index: 0, kind: input, shape index: {}]   ;;  %s2035_s1 = inlined_call_operand.vmem [shape: bf16[23,128], index: 1, kind: input, shape index: {}]   ;;  %s2036_s2 = inlined_call_operand.vmem [shape: f32[1,128], index: 2, kind: input, shape index: {}]   ;;  %s2037_s3 = inlined_call_operand.vmem [shape: bf16[128,256], index: 3, kind: input, shape index: {}]   ;;  %s2038_s4 = inlined_call_operand.vmem [shape: f32[1,256], index: 4, kind: input, shape index: {}]   ;;  %s2039_s5 = inlined_call_operand.hbm [shape: bf16[256,256], index: 5, kind: input, shape index: {}]   ;;  %s2040_s6 = inlined_call_operand.vmem [shape: f32[1,256], index: 6, kind: input, shape index: {}]   ;;  %s2041_s7 = inlined_call_operand.hbm [shape: bf16[256,128], index: 7, kind: input, shape index: {}]   ;;  %s2042_s8 = inlined_call_operand.vmem [shape: f32[1,128], index: 8, kind: input, shape index: {}]   ;;  %s2043_s9 = inlined_call_operand.vmem [shape: f32[1,128], index: 9, kind: input, shape index: {}]   ;;  %s2044_s10 = inlined_call_operand.<no memory space> [shape: f32[1,1], index: 10, kind: input, shape index: {}]   ;;  %s2045_s11 = inlined_call_operand.vmem [shape: f32[256,1], index: 11, kind: output, shape index: {}]  }
   0x1   :  { %v16_v0 = vstv %s2044_s10 }
   0x2   :  { %17 = vst [vmem:[#allocation2] sm:$0x1] %v16_v0 }
   0x3   :  { %18 = vsyncpa [#allocation4], 0 }
   0x4   :  { %19 = vsyncpa [#allocation6], 0  ;;  %s1837_s19 = smov 0  }
   0x5 LB: > { %s1766_s20 = smov [#allocation3]   ;;  %s1414_s22 = sadd.s32 4294967295, %s1764_s19   ;;  %s1764_s19 = sphi %s1837_s19, %s25_s19  }
   0x6   : > { %s316_s21 = sshll.u32 %s1766_s20, 4  ;;  %p1416_p0 = scmp.ge.s32.totalorder %s1764_s19, 1  ;;  %s317_s21 = int_to_ptr.vmem [resolvable:$true] %s316_s21 }
   0x7   : > { %p292_p1 = scmp.lt.s32.totalorder %s1764_s19, 5  ;;  %p1851_p3 = scmp.eq.s32.totalorder %s1414_s22, 0 }
   0x8   : > { %s1767_s24 = smov [#allocation5]   ;;  %s1694_s29 = scalar_lea.hbm %s2039_s5, 4096 }
   0x9   : > { %p1845_p2 = pnand %p1416_p0, %p292_p1  ;;  %s332_s25 = sshll.u32 %s1767_s24, 4  ;;  %s1863_s25 = int_to_ptr.vmem [resolvable:$true] %s332_s25 }
   0xa   : > { %s2050_s23 = scalar_select %p1851_p3, 1, 0 }
   0xb   : > { %s2049_s10 = scalar_select %p1845_p2, 1, 0 }
   0xc   : > { %p1573_p4 = pneg %p1845_p2  ;;  %p1695_p6 = scmp.ne.s32.totalorder %s2039_s5, %s1694_s29 }
   0xd   : > { %p1701_p10 = scmp.lt.u32.totalorder %s1694_s29, %s2039_s5 }
   0xe   : > { %p1859_p5 = pnand %p1851_p3, %p1573_p4 }
  0x10   : > { %p1696_p7 = pneg %p1859_p5 }
  0x12   : > { %p1697_p8 = pnand %p1696_p7, %p1695_p6 }
  0x14   : > { %p1698_p9 = pneg %p1697_p8 }
  0x16   : > { %p1703_p11 = pnand %p1701_p10, %p1698_p9 }
  0x18   : > { %1706 = shalt.err (!%p1703_p11)
}
  0x19   : > { %s1707_s15 = scalar_lea.vmem %s317_s21, 4096  ;;  %p1715_p1 = scmp.lt.s32.totalorder %s317_s21, %s317_s21 }
  0x1a   : > { %p1708_p12 = scmp.ne.s32.totalorder %s317_s21, %s1707_s15  ;;  %p1716_p4 = scmp.lt.s32.totalorder %s1707_s15, %s1707_s15 }
  0x1c   : > { %p1710_p13 = pnand %p1708_p12, %p1696_p7  ;;  %p1717_p3 = por %p1716_p4, %p1715_p1 }
  0x1e   : > { %p1711_p0 = pneg %p1710_p13 }
  0x20   : > { %p1718_p2 = pnand %p1717_p3, %p1711_p0 }
  0x22   : > { %1721 = shalt.err (!%p1718_p2)
}
  0x23   : > { %s1768_s16 = smov 128   ;;  %s1769_s17 = smov 8  }
  0x24   : > { %1576 = dma.hbm_to_vmem [thread:$0]  (!%p1859_p5), %s2039_s5, 4096, %s317_s21, [#allocation4], %s1768_s16, %s1768_s16, %s1769_s17  }
  0x25   : > { %s1722_s28 = scalar_lea.hbm %s2041_s7, 2048 }
  0x26   : > { %p1723_p6 = scmp.ne.s32.totalorder %s2041_s7, %s1722_s28  ;;  %p1729_p8 = scmp.lt.u32.totalorder %s1722_s28, %s2041_s7 }
  0x28   : > { %p1725_p2 = pnand %p1723_p6, %p1696_p7 }
  0x2a   : > { %p1726_p3 = pneg %p1725_p2 }
  0x2c   : > { %p1731_p9 = pnand %p1729_p8, %p1726_p3 }
  0x2e   : > { %1734 = shalt.err (!%p1731_p9)
}
  0x2f   : > { %s1735_s21 = scalar_lea.vmem %s1863_s25, 2048  ;;  %p1743_p13 = scmp.lt.s32.totalorder %s1863_s25, %s1863_s25 }
  0x30   : > { %p1736_p10 = scmp.ne.s32.totalorder %s1863_s25, %s1735_s21  ;;  %p1744_p0 = scmp.lt.s32.totalorder %s1735_s21, %s1735_s21 }
  0x32   : > { %p1738_p11 = pnand %p1736_p10, %p1696_p7  ;;  %p1745_p1 = por %p1744_p0, %p1743_p13 }
  0x34   : > { %p1739_p12 = pneg %p1738_p11 }
  0x36   : > { %p1746_p4 = pnand %p1745_p1, %p1739_p12 }
  0x38   : > { %1749 = shalt.err (!%p1746_p4)
}
  0x39   : > { %s1770_s14 = smov 64   ;;  %s1771_s15 = smov 4  }
  0x3a   : > { %1579 = dma.hbm_to_vmem [thread:$0]  (!%p1859_p5), %s2041_s7, 2048, %s1863_s25, [#allocation6], %s1770_s14, %s1770_s14, %s1771_s15  }
  0x3b   : > { %p2052_p6 = scmp.ne.s32.totalorder %s2049_s10, 0 }
  0x3c   : > { %p2053_p7 = scmp.ne.s32.totalorder (!%p2052_p6), %s2050_s23, 0 }
  0x3d   : > { %366 = sbr.rel (%p2052_p6) target bundleno = 1138 (0x472), region = 64 }
  0x44   : > { %1755 = dma.done.wait (%p2053_p7), [#allocation4], 4096  }
  0x45   : > { %1757 = vsyncadd (%p2053_p7), [#allocation4], 4294963200 }
  0x46   : > { %1759 = dma.done.wait (%p2053_p7), [#allocation6], 2048  }
  0x47   : > { %1761 = vsyncadd (%p2053_p7), [#allocation6], 4294965248  ;;  %s1423_s26 = sshll.u32 %s1414_s22, 3  ;;  %vm483_vm0 = vcmask 1042432   ;;  %vm484_vm1 = vcmask 1043456   ;;  %v1772_v1 = vmov 65535  }
  0x48   : > { %p411_p5 = scmp.lt.s32.totalorder %s1423_s26, 31  ;;  %v485_v2 = vsel %vm483_vm0, 4294967295, %v1772_v1  ;;  %vm470_vm2 = vcmask 187392   ;;  %v1600_v3 = vld [vmem:[%s2035_s1] sm:$0xff]   ;;  %v1601_v5 = vld [vmem:[%s2035_s1 + $0x8] ss:$0 sps:$4 sm:$0xff]  }
  0x49   : > { %v486_v4 = vsel %vm484_vm1, %v485_v2, 0  ;;  %1553 = vmatprep.subr.bf16.mxu0 %v1600_v3  ;;  %v1606_v10 = vld [vmem:[%s2037_s3 + $0x4] ss:$8 sps:$4 sm:$0xff]   ;;  %v1608_v11 = vld [vmem:[%s2037_s3] ss:$8 sps:$4 sm:$0xff]   ;;  %v1773_v27 = vmov 0  }
  0x4a   : > { %s2055_s26 = smov (!%p411_p5, %s1423_s26), 31  ;;  %1554 = vmatpush3.bf16.msra.mxu0 %v1600_v3  ;;  %v488_v7 = vand.u32 %v1601_v5, %v486_v4  ;;  %v1609_v12 = vld [vmem:[%s2037_s3 + $0x14] ss:$8 sps:$4 sm:$0xff]   ;;  %675 = vmatprep.subr.bf16.mxu1 %v1606_v10  ;;  %v1611_v13 = vld [vmem:[%s2037_s3 + $0x10] ss:$8 sps:$4 sm:$0xff]   ;;  %vm1327_vm3 = vcmask 7168  }
  0x4b   : > { %s1424_s10 = sshll.u32 %s2055_s26, 2  ;;  %676 = vmatpush1.bf16.msra.mxu1 %v1608_v11  ;;  %v1612_v14 = vld [vmem:[%s2037_s3 + $0x24] ss:$8 sps:$4 sm:$0xff]   ;;  %v1614_v16 = vld [vmem:[%s2037_s3 + $0x20] ss:$8 sps:$4 sm:$0xff]   ;;  %707 = vmatprep.mubr.bf16.mxu1 %v1773_v27  ;;  %s1426_s14 = sshll.u32 %s2055_s26, 3 }
  0x4c   : > { %s414_s20 = scalar_lea.vmem %s2034_s0, %s1424_s10  ;;  %1555 = vmatprep.subr.bf16.mxu0 %v488_v7  ;;  %677 = vmatprep.subr.bf16.mxu1 %v1609_v12  ;;  %v1615_v17 = vld [vmem:[%s2037_s3 + $0x34] ss:$8 sps:$4 sm:$0xff]   ;;  %v1617_v18 = vld [vmem:[%s2037_s3 + $0x30] ss:$8 sps:$4 sm:$0xff]   ;;  %v1618_v19 = vld [vmem:[%s2037_s3 + $0x44] ss:$8 sps:$4 sm:$0xff]   ;;  %s420_s17 = scalar_lea.vmem %s2045_s11, %s1426_s14 }
  0x4d   : > { %v1602_v6 = vld [vmem:[%s414_s20] sm:$0xff]   ;;  %v1603_v8 = vld [vmem:[%s414_s20 + $0x8] sm:$0xff]   ;;  %v1604_v9 = vld [vmem:[%s414_s20 + $0x10] sm:$0xff]  }
  0x4e   : > { %1557 = vmatprep.mubr.msk.bf16.mxu0 %vm470_vm2, %v1602_v6  ;;  %1556 = vmatpush3.bf16.msra.mxu0 %v488_v7  ;;  %v1605_v15 = vld [vmem:[%s414_s20 + $0x18] sm:$0xff]   ;;  %v1620_v20 = vld [vmem:[%s2037_s3 + $0x40] ss:$8 sps:$4 sm:$0xff]   ;;  %v1624_v23 = vld [vmem:[%s2037_s3 + $0x64] ss:$8 sps:$4 sm:$0xff]  }
  0x4f   : > { %678 = vmatpush1.bf16.msra.mxu1 %v1611_v13  ;;  %v1621_v21 = vld [vmem:[%s2037_s3 + $0x54] ss:$8 sps:$4 sm:$0xff]   ;;  %v1623_v22 = vld [vmem:[%s2037_s3 + $0x50] ss:$8 sps:$4 sm:$0xff]   ;;  %v1626_v24 = vld [vmem:[%s2037_s3 + $0x60] ss:$8 sps:$4 sm:$0xff]  }
  0x50   : > { %679 = vmatprep.subr.bf16.mxu1 %v1612_v14  ;;  %v1627_v25 = vld [vmem:[%s2037_s3 + $0x74] ss:$8 sps:$4 sm:$0xff]   ;;  %v1629_v26 = vld [vmem:[%s2037_s3 + $0x70] ss:$8 sps:$4 sm:$0xff]   ;;  %v1630_v28 = vld [vmem:[#allocation3] ss:$8 sps:$4 sm:$0xff]  }
  0x51   : > { %1558 = vmatmul.mubr.msk.bf16.vlgmr.msra.gmra.mrb[0].mxu0 %vm470_vm2, %v1603_v8  ;;  %v1632_v29 = vld [vmem:[#allocation3 + $0x4] ss:$8 sps:$4 sm:$0xff]   ;;  %v1635_v30 = vld [vmem:[#allocation3 + $0x14] ss:$8 sps:$4 sm:$0xff]   ;;  %v1633_v31 = vld [vmem:[#allocation3 + $0x10] ss:$8 sps:$4 sm:$0xff]  }
  0x52   : > { %1561 = vmatprep.mubr.msk.bf16.mxu0 %vm470_vm2, %v1604_v9  ;;  %976 = vmatprep.subr.bf16.mxu0 %v1632_v29  ;;  %v1638_v32 = vld [vmem:[#allocation3 + $0x24] ss:$8 sps:$4 sm:$0xff]   ;;  %v1636_v33 = vld [vmem:[#allocation3 + $0x20] ss:$8 sps:$4 sm:$0xff]   ;;  %v1641_v34 = vld [vmem:[#allocation3 + $0x34] ss:$8 sps:$4 sm:$0xff]  }
  0x53   : > { %680 = vmatpush1.bf16.msra.mxu1 %v1614_v16  ;;  %977 = vmatpush1.bf16.msra.mxu0 %v1630_v28  ;;  %v1639_v35 = vld [vmem:[#allocation3 + $0x30] ss:$8 sps:$4 sm:$0xff]   ;;  %v1644_v36 = vld [vmem:[#allocation3 + $0x44] ss:$8 sps:$4 sm:$0xff]   ;;  %v1642_v37 = vld [vmem:[#allocation3 + $0x40] ss:$8 sps:$4 sm:$0xff]  }
  0x54   : > { %681 = vmatprep.subr.bf16.mxu1 %v1615_v17  ;;  %978 = vmatprep.subr.bf16.mxu0 %v1635_v30  ;;  %v1647_v38 = vld [vmem:[#allocation3 + $0x54] ss:$8 sps:$4 sm:$0xff]   ;;  %v1645_v39 = vld [vmem:[#allocation3 + $0x50] ss:$8 sps:$4 sm:$0xff]   ;;  %v1650_v40 = vld [vmem:[#allocation3 + $0x64] ss:$8 sps:$4 sm:$0xff]  }
  0x55   : > { %v1648_v41 = vld [vmem:[#allocation3 + $0x60] ss:$8 sps:$4 sm:$0xff]   ;;  %v1653_v42 = vld [vmem:[#allocation3 + $0x74] ss:$8 sps:$4 sm:$0xff]   ;;  %v1651_v43 = vld [vmem:[#allocation3 + $0x70] ss:$8 sps:$4 sm:$0xff]  }
  0x56   : > { %v1656_v44 = vld [vmem:[#allocation3 + $0x84] ss:$8 sps:$4 sm:$0xff]   ;;  %v1654_v45 = vld [vmem:[#allocation3 + $0x80] ss:$8 sps:$4 sm:$0xff]   ;;  %v1659_v46 = vld [vmem:[#allocation3 + $0x94] ss:$8 sps:$4 sm:$0xff]  }
  0x57   : > { %682 = vmatpush1.bf16.msra.mxu1 %v1617_v18  ;;  %979 = vmatpush1.bf16.msra.mxu0 %v1633_v31  ;;  %v1657_v47 = vld [vmem:[#allocation3 + $0x90] ss:$8 sps:$4 sm:$0xff]   ;;  %v1662_v48 = vld [vmem:[#allocation3 + $0xa4] ss:$8 sps:$4 sm:$0xff]   ;;  %v1660_v49 = vld [vmem:[#allocation3 + $0xa0] ss:$8 sps:$4 sm:$0xff]  }
  0x58   : > { %683 = vmatprep.subr.bf16.mxu1 %v1618_v19  ;;  %980 = vmatprep.subr.bf16.mxu0 %v1638_v32  ;;  %v1665_v50 = vld [vmem:[#allocation3 + $0xb4] ss:$8 sps:$4 sm:$0xff]   ;;  %v1663_v51 = vld [vmem:[#allocation3 + $0xb0] ss:$8 sps:$4 sm:$0xff]   ;;  %v1668_v52 = vld [vmem:[#allocation3 + $0xc4] ss:$8 sps:$4 sm:$0xff]  }
  0x59   : > { %1562 = vmatmul.mubr.msk.bf16.gmra.mrb[4].mxu0 %vm470_vm2, %v1605_v15  ;;  %v1666_v53 = vld [vmem:[#allocation3 + $0xc0] ss:$8 sps:$4 sm:$0xff]   ;;  %v1671_v54 = vld [vmem:[#allocation3 + $0xd4] ss:$8 sps:$4 sm:$0xff]   ;;  %v1669_v55 = vld [vmem:[#allocation3 + $0xd0] ss:$8 sps:$4 sm:$0xff]  }
  0x5a   : > { %v1427_v56 = vld [vmem:[%s2036_s2] ss:$0 sm:$0xff]  ;;  %v1680_v28 = vld [vmem:[#allocation5 + $0x48] sm:$0xff]   ;;  %v1682_v30 = vld [vmem:[#allocation5 + $0x50] sm:$0xff]  }
  0x5b   : > { %684 = vmatpush1.bf16.msra.mxu1 %v1620_v20  ;;  %981 = vmatpush1.bf16.msra.mxu0 %v1636_v33  ;;  %v1681_v29 = vld [vmem:[#allocation5 + $0x8] sm:$0xff]   ;;  %v1683_v31 = vld [vmem:[#allocation5 + $0x10] sm:$0xff]   ;;  %v1685_v32 = vld [vmem:[#allocation5 + $0x18] sm:$0xff]  }
  0x5c   : > { %685 = vmatprep.subr.bf16.mxu1 %v1621_v21  ;;  %982 = vmatprep.subr.bf16.mxu0 %v1641_v34  ;;  %v1674_v21 = vld [vmem:[#allocation3 + $0xe4] ss:$8 sps:$4 sm:$0xff]  }
  0x5d   : > { %v1686_v33 = vld [vmem:[#allocation5 + $0x60] sm:$0xff]  }
  0x5e   : > { %v1687_v34 = vld [vmem:[#allocation5 + $0x20] sm:$0xff]  }
  0x5f   : > { %686 = vmatpush1.bf16.msra.mxu1 %v1623_v22  ;;  %983 = vmatpush1.bf16.msra.mxu0 %v1639_v35  ;;  %v1672_v22 = vld [vmem:[#allocation3 + $0xe0] ss:$8 sps:$4 sm:$0xff]  }
  0x60   : > { %687 = vmatprep.subr.bf16.mxu1 %v1624_v23  ;;  %984 = vmatprep.subr.bf16.mxu0 %v1644_v36  ;;  %v1677_v23 = vld [vmem:[#allocation3 + $0xf4] ss:$8 sps:$4 sm:$0xff]   ;;  %v1688_v35 = vld [vmem:[#allocation5 + $0x68] sm:$0xff]  }
  0x61   : > { %v1689_v36 = vld [vmem:[#allocation5 + $0x28] sm:$0xff]  }
  0x63   : > { %688 = vmatpush1.bf16.msra.mxu1 %v1626_v24  ;;  %985 = vmatpush1.bf16.msra.mxu0 %v1642_v37  ;;  %v1675_v24 = vld [vmem:[#allocation3 + $0xf0] ss:$8 sps:$4 sm:$0xff]   ;;  %v585_v37 = vlaneseq }
  0x64   : > { %689 = vmatprep.subr.bf16.mxu1 %v1627_v25  ;;  %986 = vmatprep.subr.bf16.mxu0 %v1647_v38  ;;  %v1678_v25 = vld [vmem:[#allocation5 + $0x40] sm:$0xff]  }
  0x65   : > { %v1995_v38 = vshrl.u32 %v585_v37, 7  ;;  %v1691_v37 = vld [vmem:[#allocation5 + $0x30] sm:$0xff]  }
  0x67   : > { %690 = vmatpush1.bf16.msra.mxu1 %v1629_v26  ;;  %987 = vmatpush1.bf16.msra.mxu0 %v1645_v39  ;;  %v1679_v26 = vld [vmem:[#allocation5] sm:$0xff]   ;;  %v587_v39 = vsub.s32 0, %v1995_v38 }
  0x68   : > { %988 = vmatprep.subr.bf16.mxu0 %v1650_v40  ;;  %1513 = vmatprep.subr.bf16.mxu1 %v1678_v25  ;;  %v583_v40 = vld [vmem:[%s2038_s4] sm:$0x3] }
  0x6b   : > { %989 = vmatpush1.bf16.msra.mxu0 %v1648_v41  ;;  %v591_v41 = vsub.s32 1, %v1995_v38 }
  0x6c   : > { %990 = vmatprep.subr.bf16.mxu0 %v1653_v42  ;;  %v588_v42 = vrot.slane %v583_v40, %v587_v39 }
  0x6f   : > { %991 = vmatpush1.bf16.msra.mxu0 %v1651_v43  ;;  %v592_v43 = vrot.slane %v583_v40, %v591_v41  ;;  %v1692_v40 = vld [vmem:[#allocation5 + $0x78] sm:$0xff]  }
  0x70   : > { %992 = vmatprep.subr.bf16.mxu0 %v1656_v44 }
  0x73   : > { %993 = vmatpush1.bf16.msra.mxu0 %v1654_v45 }
  0x74   : > { %994 = vmatprep.subr.bf16.mxu0 %v1659_v46 }
  0x77   : > { %995 = vmatpush1.bf16.msra.mxu0 %v1657_v47 }
  0x78   : > { %996 = vmatprep.subr.bf16.mxu0 %v1662_v48 }
  0x7b   : > { %997 = vmatpush1.bf16.msra.mxu0 %v1660_v49 }
  0x7c   : > { %998 = vmatprep.subr.bf16.mxu0 %v1665_v50 }
  0x7f   : > { %999 = vmatpush1.bf16.msra.mxu0 %v1663_v51 }
  0x80   : > { %1000 = vmatprep.subr.bf16.mxu0 %v1668_v52 }
  0x83   : > { %1001 = vmatpush1.bf16.msra.mxu0 %v1666_v53 }
  0x84   : > { %1002 = vmatprep.subr.bf16.mxu0 %v1671_v54 }
  0x87   : > { %1003 = vmatpush1.bf16.msra.mxu0 %v1669_v55 }
  0x88   : > { %1004 = vmatprep.subr.bf16.mxu0 %v1674_v21 }
  0x8b   : > { %1005 = vmatpush1.bf16.msra.mxu0 %v1672_v22 }
  0x8c   : > { %1006 = vmatprep.subr.bf16.mxu0 %v1677_v23 }
  0x8f   : > { %1007 = vmatpush1.bf16.msra.mxu0 %v1675_v24 }
 0x124   : > { %v1559_v57 = vpop.f32.mrb[0].mxu0 }
 0x125   : > { %v533_v58 = vadd.f32 %v1559_v57, %v1427_v56  ;;  %v524_v59 = vpop.f32.mrb[1].mxu0 }
 0x126   : > { %v525_v60 = vadd.f32 %v1427_v56, %v524_v59  ;;  %v1560_v61 = vpop.f32.mrb[2].mxu0 }
 0x127   : > { %v536_v62 = vadd.f32 %v1560_v61, %v1427_v56  ;;  %v527_v63 = vpop.f32.mrb[3].mxu0  ;;  %v557_v1 = vmax.f32 %v533_v58, 0.0 }
 0x128   : > { %v528_v0 = vadd.f32 %v1427_v56, %v527_v63  ;;  %v555_v3 = vmax.f32 %v525_v60, 0.0 }
 0x129   : > { %v558_v2 = vmax.f32 %v536_v62, 0.0 }
 0x12a   : > { %v556_v4 = vmax.f32 %v528_v0, 0.0 }
 0x12b   : > { %v564_v5 = vpack.c.bf16 %v558_v2, %v557_v1 }
 0x12c   : > { %v563_v6 = vpack.c.bf16 %v556_v4, %v555_v3  ;;  %v1563_v7 = vpop.f32.mrb[4].mxu0 }
 0x12d   : > { %v549_v8 = vadd.f32 %v1563_v7, %v1427_v56  ;;  %v540_v9 = vpop.f32.mrb[5].mxu0 }
 0x12e   : > { %708 = vmatmul.mubr.bf16.vlgmr.msra.gmra.mrb[0].mxu1 %v563_v6  ;;  %v541_v10 = vadd.f32 %v1427_v56, %v540_v9  ;;  %v1564_v11 = vpop.f32.mrb[6].mxu0 }
 0x12f   : > { %v561_v12 = vmax.f32 %v549_v8, 0.0  ;;  %v552_v13 = vadd.f32 %v1564_v11, %v1427_v56  ;;  %v543_v14 = vpop.f32.mrb[7].mxu0  ;;  %717 = vmatprep.mubr.bf16.mxu1 %v1773_v27  ;;  %1514 = vmatpush3.bf16.msra.mxu1 %v1679_v26 }
 0x130   : > { %v559_v15 = vmax.f32 %v541_v10, 0.0  ;;  %v544_v16 = vadd.f32 %v1427_v56, %v543_v14  ;;  %1515 = vmatprep.subr.bf16.mxu1 %v1680_v28 }
 0x131   : > { %v562_v17 = vmax.f32 %v552_v13, 0.0 }
 0x132   : > { %v560_v18 = vmax.f32 %v544_v16, 0.0 }
 0x133   : > { %v566_v19 = vpack.c.bf16 %v562_v17, %v561_v12  ;;  %1516 = vmatpush3.bf16.msra.mxu1 %v1681_v29 }
 0x134   : > { %v565_v20 = vpack.c.bf16 %v560_v18, %v559_v15  ;;  %1517 = vmatprep.subr.bf16.mxu1 %v1682_v30 }
 0x136   : > { %718 = vmatmul.mubr.bf16.gmra.mrb[4].mxu1 %v564_v5 }
 0x137   : > { %727 = vmatprep.mubr.bf16.mxu1 %v1773_v27  ;;  %1518 = vmatpush3.bf16.msra.mxu1 %v1683_v31 }
 0x13e   : > { %728 = vmatmul.mubr.bf16.gmra.mrb[8].mxu1 %v565_v20 }
 0x13f   : > { %737 = vmatprep.mubr.bf16.mxu1 %v1773_v27  ;;  %v1684_v27 = vld [vmem:[#allocation5 + $0x58] sm:$0xff]  }
 0x140   : > { %1519 = vmatprep.subr.bf16.mxu1 %v1684_v27 }
 0x141   : > { %1520 = vmatpush3.bf16.msra.mxu1 %v1685_v32 }
 0x142   : > { %1521 = vmatprep.subr.bf16.mxu1 %v1686_v33 }
 0x145   : > { %1522 = vmatpush3.bf16.msra.mxu1 %v1687_v34 }
 0x146   : > { %738 = vmatmul.mubr.bf16.gmra.mrb[12].mxu1 %v566_v19  ;;  %1523 = vmatprep.subr.bf16.mxu1 %v1688_v35 }
 0x149   : > { %1524 = vmatpush3.bf16.msra.mxu1 %v1689_v36  ;;  %v1690_v36 = vld [vmem:[#allocation5 + $0x70] sm:$0xff]  }
 0x14a   : > { %1525 = vmatprep.subr.bf16.mxu1 %v1690_v36 }
 0x14d   : > { %1526 = vmatpush3.bf16.msra.mxu1 %v1691_v37  ;;  %v1486_v37 = vld [vmem:[%s2042_s8] ss:$0 sm:$0xff] }
 0x14e   : > { %1527 = vmatprep.subr.bf16.mxu1 %v1692_v40 }
 0x201   : > { %v709_v44 = vpop.f32.mrb[0].mxu1 }
 0x202   : > { %v710_v45 = vadd.f32 %v709_v44, %v588_v42  ;;  %v711_v46 = vpop.f32.mrb[1].mxu1  ;;  %v1693_v44 = vld [vmem:[#allocation5 + $0x38] sm:$0xff]  }
 0x203   : > { %v712_v47 = vadd.f32 %v711_v46, %v592_v43  ;;  %v713_v48 = vpop.f32.mrb[2].mxu1  ;;  %1528 = vmatpush3.bf16.msra.mxu1 %v1693_v44 }
 0x204   : > { %v714_v49 = vadd.f32 %v713_v48, %v588_v42  ;;  %v715_v50 = vpop.f32.mrb[3].mxu1  ;;  %v748_v52 = vmax.f32 %v710_v45, 0.0 }
 0x205   : > { %v716_v51 = vadd.f32 %v715_v50, %v592_v43  ;;  %v749_v54 = vmax.f32 %v712_v47, 0.0 }
 0x206   : > { %v750_v53 = vmax.f32 %v714_v49, 0.0 }
 0x207   : > { %v751_v55 = vmax.f32 %v716_v51, 0.0 }
 0x208   : > { %v764_v56 = vpack.c.bf16 %v750_v53, %v748_v52 }
 0x209   : > { %v765_v57 = vpack.c.bf16 %v751_v55, %v749_v54  ;;  %v719_v58 = vpop.f32.mrb[4].mxu1 }
 0x20a   : > { %v720_v59 = vadd.f32 %v719_v58, %v588_v42  ;;  %v721_v60 = vpop.f32.mrb[5].mxu1 }
 0x20b   : > { %v722_v61 = vadd.f32 %v721_v60, %v592_v43  ;;  %v723_v62 = vpop.f32.mrb[6].mxu1  ;;  %1008 = vmatprep.mubr.bf16.mxu0 %v765_v57 }
 0x20c   : > { %v724_v63 = vadd.f32 %v723_v62, %v588_v42  ;;  %v725_v0 = vpop.f32.mrb[7].mxu1  ;;  %1009 = vmatmul.mubr.bf16.vlgmr.msra.gmra.mrb[8].mxu0 %v764_v56  ;;  %v752_v2 = vmax.f32 %v720_v59, 0.0 }
 0x20d   : > { %v726_v1 = vadd.f32 %v725_v0, %v592_v43  ;;  %v753_v4 = vmax.f32 %v722_v61, 0.0 }
 0x20e   : > { %v754_v3 = vmax.f32 %v724_v63, 0.0 }
 0x20f   : > { %v755_v5 = vmax.f32 %v726_v1, 0.0 }
 0x210   : > { %v766_v6 = vpack.c.bf16 %v754_v3, %v752_v2 }
 0x211   : > { %v767_v7 = vpack.c.bf16 %v755_v5, %v753_v4  ;;  %v729_v8 = vpop.f32.mrb[8].mxu1 }
 0x212   : > { %v730_v9 = vadd.f32 %v729_v8, %v588_v42  ;;  %v731_v10 = vpop.f32.mrb[9].mxu1 }
 0x213   : > { %v732_v11 = vadd.f32 %v731_v10, %v592_v43  ;;  %v733_v12 = vpop.f32.mrb[10].mxu1  ;;  %1018 = vmatprep.mubr.bf16.mxu0 %v767_v7 }
 0x214   : > { %v734_v13 = vadd.f32 %v733_v12, %v588_v42  ;;  %v735_v14 = vpop.f32.mrb[11].mxu1  ;;  %1019 = vmatmul.mubr.bf16.gmra.mrb[12].mxu0 %v766_v6  ;;  %v756_v16 = vmax.f32 %v730_v9, 0.0 }
 0x215   : > { %v736_v15 = vadd.f32 %v735_v14, %v592_v43  ;;  %v757_v18 = vmax.f32 %v732_v11, 0.0 }
 0x216   : > { %v758_v17 = vmax.f32 %v734_v13, 0.0 }
 0x217   : > { %v759_v19 = vmax.f32 %v736_v15, 0.0 }
 0x218   : > { %v768_v20 = vpack.c.bf16 %v758_v17, %v756_v16 }
 0x219   : > { %v769_v21 = vpack.c.bf16 %v759_v19, %v757_v18  ;;  %v739_v22 = vpop.f32.mrb[12].mxu1 }
 0x21a   : > { %v740_v23 = vadd.f32 %v739_v22, %v588_v42  ;;  %v741_v24 = vpop.f32.mrb[13].mxu1 }
 0x21b   : > { %v742_v25 = vadd.f32 %v741_v24, %v592_v43  ;;  %v743_v26 = vpop.f32.mrb[14].mxu1  ;;  %1028 = vmatprep.mubr.bf16.mxu0 %v769_v21 }
 0x21c   : > { %v744_v28 = vadd.f32 %v743_v26, %v588_v42  ;;  %v745_v29 = vpop.f32.mrb[15].mxu1  ;;  %1029 = vmatmul.mubr.bf16.gmra.mrb[16].mxu0 %v768_v20  ;;  %v760_v31 = vmax.f32 %v740_v23, 0.0  ;;  %v804_v42 = vld [vmem:[%s2040_s6] sm:$0x3] }
 0x21d   : > { %v746_v30 = vadd.f32 %v745_v29, %v592_v43  ;;  %v761_v32 = vmax.f32 %v742_v25, 0.0  ;;  %v809_v43 = vrot.slane %v804_v42, %v587_v39  ;;  %v813_v45 = vrot.slane %v804_v42, %v591_v41 }
 0x21e   : > { %v762_v27 = vmax.f32 %v744_v28, 0.0 }
 0x21f   : > { %v763_v33 = vmax.f32 %v746_v30, 0.0 }
 0x220   : > { %v770_v34 = vpack.c.bf16 %v762_v27, %v760_v31 }
 0x221   : > { %v771_v35 = vpack.c.bf16 %v763_v33, %v761_v32 }
 0x223   : > { %1038 = vmatprep.mubr.bf16.mxu0 %v771_v35 }
 0x224   : > { %1039 = vmatmul.mubr.bf16.gmra.mrb[20].mxu0 %v770_v34 }
 0x2df   : > { %v1010_v46 = vpop.f32.mrb[8].mxu0 }
 0x2e0   : > { %v1011_v47 = vadd.f32 %v1010_v46, %v809_v43  ;;  %v1012_v48 = vpop.f32.mrb[9].mxu0 }
 0x2e1   : > { %v1013_v49 = vadd.f32 %v1012_v48, %v813_v45  ;;  %v1014_v50 = vpop.f32.mrb[10].mxu0 }
 0x2e2   : > { %v1015_v51 = vadd.f32 %v1014_v50, %v809_v43  ;;  %v1016_v52 = vpop.f32.mrb[11].mxu0  ;;  %v1049_v54 = vmax.f32 %v1011_v47, 0.0 }
 0x2e3   : > { %v1017_v53 = vadd.f32 %v1016_v52, %v813_v45  ;;  %v1050_v56 = vmax.f32 %v1013_v49, 0.0 }
 0x2e4   : > { %v1051_v55 = vmax.f32 %v1015_v51, 0.0 }
 0x2e5   : > { %v1052_v57 = vmax.f32 %v1017_v53, 0.0 }
 0x2e6   : > { %v1065_v58 = vpack.c.bf16 %v1051_v55, %v1049_v54 }
 0x2e7   : > { %v1066_v59 = vpack.c.bf16 %v1052_v57, %v1050_v56  ;;  %v1020_v60 = vpop.f32.mrb[12].mxu0 }
 0x2e8   : > { %v1021_v61 = vadd.f32 %v1020_v60, %v809_v43  ;;  %v1022_v39 = vpop.f32.mrb[13].mxu0 }
 0x2e9   : > { %v1023_v62 = vadd.f32 %v1022_v39, %v813_v45  ;;  %v1024_v38 = vpop.f32.mrb[14].mxu0  ;;  %1240 = vmatprep.mubr.bf16.mxu1 %v1066_v59 }
 0x2ea   : > { %v1025_v41 = vadd.f32 %v1024_v38, %v809_v43  ;;  %v1026_v63 = vpop.f32.mrb[15].mxu0  ;;  %1241 = vmatmul.mubr.bf16.vlgmr.msra.gmra.mrb[16].mxu1 %v1065_v58  ;;  %v1053_v1 = vmax.f32 %v1021_v61, 0.0 }
 0x2eb   : > { %v1027_v0 = vadd.f32 %v1026_v63, %v813_v45  ;;  %v1054_v3 = vmax.f32 %v1023_v62, 0.0 }
 0x2ec   : > { %v1055_v2 = vmax.f32 %v1025_v41, 0.0 }
 0x2ed   : > { %v1056_v4 = vmax.f32 %v1027_v0, 0.0 }
 0x2ee   : > { %v1067_v5 = vpack.c.bf16 %v1055_v2, %v1053_v1 }
 0x2ef   : > { %v1068_v6 = vpack.c.bf16 %v1056_v4, %v1054_v3  ;;  %v1030_v7 = vpop.f32.mrb[16].mxu0 }
 0x2f0   : > { %v1031_v8 = vadd.f32 %v1030_v7, %v809_v43  ;;  %v1032_v9 = vpop.f32.mrb[17].mxu0 }
 0x2f1   : > { %v1033_v10 = vadd.f32 %v1032_v9, %v813_v45  ;;  %v1034_v11 = vpop.f32.mrb[18].mxu0  ;;  %1248 = vmatprep.mubr.bf16.mxu1 %v1068_v6 }
 0x2f2   : > { %v1035_v12 = vadd.f32 %v1034_v11, %v809_v43  ;;  %v1036_v13 = vpop.f32.mrb[19].mxu0  ;;  %1249 = vmatmul.mubr.bf16.gmra.mrb[20].mxu1 %v1067_v5  ;;  %v1057_v15 = vmax.f32 %v1031_v8, 0.0 }
 0x2f3   : > { %v1037_v14 = vadd.f32 %v1036_v13, %v813_v45  ;;  %v1058_v17 = vmax.f32 %v1033_v10, 0.0 }
 0x2f4   : > { %v1059_v16 = vmax.f32 %v1035_v12, 0.0 }
 0x2f5   : > { %v1060_v18 = vmax.f32 %v1037_v14, 0.0 }
 0x2f6   : > { %v1069_v19 = vpack.c.bf16 %v1059_v16, %v1057_v15 }
 0x2f7   : > { %v1070_v20 = vpack.c.bf16 %v1060_v18, %v1058_v17  ;;  %v1040_v21 = vpop.f32.mrb[20].mxu0 }
 0x2f8   : > { %v1041_v22 = vadd.f32 %v1040_v21, %v809_v43  ;;  %v1042_v23 = vpop.f32.mrb[21].mxu0  ;;  %v1504_v21 = vld [vmem:[#allocation2] ss:$0 sm:$0xff] }
 0x2f9   : > { %v1043_v24 = vadd.f32 %v1042_v23, %v813_v45  ;;  %v1044_v25 = vpop.f32.mrb[22].mxu0  ;;  %1256 = vmatprep.mubr.bf16.mxu1 %v1070_v20 }
 0x2fa   : > { %v1045_v26 = vadd.f32 %v1044_v25, %v809_v43  ;;  %v1046_v28 = vpop.f32.mrb[23].mxu0  ;;  %1257 = vmatmul.mubr.bf16.gmra.mrb[24].mxu1 %v1069_v19  ;;  %v1061_v30 = vmax.f32 %v1041_v22, 0.0 }
 0x2fb   : > { %v1047_v29 = vadd.f32 %v1046_v28, %v813_v45  ;;  %v1062_v27 = vmax.f32 %v1043_v24, 0.0  ;;  %v1503_v45 = vld [vmem:[%s2043_s9] ss:$0 sm:$0xff] }
 0x2fc   : > { %v1063_v31 = vmax.f32 %v1045_v26, 0.0 }
 0x2fd   : > { %v1064_v32 = vmax.f32 %v1047_v29, 0.0 }
 0x2fe   : > { %v1071_v33 = vpack.c.bf16 %v1063_v31, %v1061_v30 }
 0x2ff   : > { %v1072_v34 = vpack.c.bf16 %v1064_v32, %v1062_v27 }
 0x301   : > { %1264 = vmatprep.mubr.bf16.mxu1 %v1072_v34 }
 0x302   : > { %1265 = vmatmul.mubr.bf16.gmra.mrb[28].mxu1 %v1071_v33 }
 0x3bd   : > { %v1529_v35 = vpop.f32.mrb[16].mxu1 }
 0x3be   : > { %v1530_v36 = vpop.f32.mrb[17].mxu1 }
 0x3bf   : > { %v1531_v40 = vadd.f32 %v1530_v36, %v1529_v35  ;;  %v1532_v44 = vpop.f32.mrb[18].mxu1 }
 0x3c0   : > { %v1533_v42 = vpop.f32.mrb[19].mxu1 }
 0x3c1   : > { %v1534_v43 = vadd.f32 %v1533_v42, %v1532_v44  ;;  %v1243_v46 = vadd.f32 %v1531_v40, %v1486_v37 }
 0x3c3   : > { %v1246_v47 = vadd.f32 %v1534_v43, %v1486_v37  ;;  %v1273_v48 = vmax.f32 %v1243_v46, 0.0 }
 0x3c5   : > { %v1274_v49 = vmax.f32 %v1246_v47, 0.0  ;;  %v1535_v50 = vpop.f32.mrb[20].mxu1  ;;  %v1288_v51 = vmul.f32 %v1503_v45, %v1273_v48 }
 0x3c6   : > { %v1536_v52 = vpop.f32.mrb[21].mxu1 }
 0x3c7   : > { %v1537_v53 = vadd.f32 %v1536_v52, %v1535_v50  ;;  %v1538_v54 = vpop.f32.mrb[22].mxu1  ;;  %1296 = vadd.xlane.f32.xlu0 %v1288_v51  ;;  %v1289_v57 = vmul.f32 %v1503_v45, %v1274_v49 }
 0x3c8   : > { %v1539_v55 = vpop.f32.mrb[23].mxu1 }
 0x3c9   : > { %v1540_v56 = vadd.f32 %v1539_v55, %v1538_v54  ;;  %v1251_v58 = vadd.f32 %v1537_v53, %v1486_v37 }
 0x3cb   : > { %v1254_v59 = vadd.f32 %v1540_v56, %v1486_v37  ;;  %1298 = vadd.xlane.f32.xlu0 %v1289_v57  ;;  %v1275_v60 = vmax.f32 %v1251_v58, 0.0 }
 0x3cd   : > { %v1276_v61 = vmax.f32 %v1254_v59, 0.0  ;;  %v1541_v39 = vpop.f32.mrb[24].mxu1  ;;  %v1290_v62 = vmul.f32 %v1503_v45, %v1275_v60 }
 0x3ce   : > { %v1542_v38 = vpop.f32.mrb[25].mxu1 }
 0x3cf   : > { %v1543_v41 = vadd.f32 %v1542_v38, %v1541_v39  ;;  %v1544_v63 = vpop.f32.mrb[26].mxu1  ;;  %1300 = vadd.xlane.f32.xlu1 %v1290_v62  ;;  %v1291_v3 = vmul.f32 %v1503_v45, %v1276_v61 }
 0x3d0   : > { %v1545_v0 = vpop.f32.mrb[27].mxu1 }
 0x3d1   : > { %v1259_v1 = vadd.f32 %v1543_v41, %v1486_v37  ;;  %v1546_v2 = vadd.f32 %v1545_v0, %v1544_v63 }
 0x3d3   : > { %v1277_v4 = vmax.f32 %v1259_v1, 0.0  ;;  %v1262_v5 = vadd.f32 %v1546_v2, %v1486_v37  ;;  %1302 = vadd.xlane.f32.xlu1 %v1291_v3 }
 0x3d5   : > { %v1278_v6 = vmax.f32 %v1262_v5, 0.0  ;;  %v1547_v7 = vpop.f32.mrb[28].mxu1  ;;  %v1292_v8 = vmul.f32 %v1503_v45, %v1277_v4 }
 0x3d6   : > { %v1548_v9 = vpop.f32.mrb[29].mxu1 }
 0x3d7   : > { %v1549_v10 = vadd.f32 %v1548_v9, %v1547_v7  ;;  %v1550_v11 = vpop.f32.mrb[30].mxu1  ;;  %1304 = vadd.xlane.f32.xlu0 %v1292_v8  ;;  %v1293_v12 = vmul.f32 %v1503_v45, %v1278_v6 }
 0x3d8   : > { %v1551_v13 = vpop.f32.mrb[31].mxu1 }
 0x3d9   : > { %v1267_v14 = vadd.f32 %v1549_v10, %v1486_v37  ;;  %v1552_v15 = vadd.f32 %v1551_v13, %v1550_v11  ;;  %1306 = vadd.xlane.f32.xlu1 %v1293_v12 }
 0x3db   : > { %v1279_v16 = vmax.f32 %v1267_v14, 0.0  ;;  %v1270_v17 = vadd.f32 %v1552_v15, %v1486_v37 }
 0x3dd   : > { %v1280_v18 = vmax.f32 %v1270_v17, 0.0  ;;  %v1294_v19 = vmul.f32 %v1503_v45, %v1279_v16 }
 0x3df   : > { %1308 = vadd.xlane.f32.xlu0 %v1294_v19  ;;  %v1295_v20 = vmul.f32 %v1503_v45, %v1280_v18 }
 0x3e1   : > { %1310 = vadd.xlane.f32.xlu1 %v1295_v20 }
 0x454   : > { %v1297_v22 = vpop.xlane.xlu0 %1296 }
 0x455   : > { %v1319_v23 = vadd.f32 %v1504_v21, %v1297_v22 }
 0x457   : > { %1328 = vst.msk [vmem:[%s420_s17] sm:$0xff] %vm1327_vm3, %v1319_v23 }
 0x458   : > { %v1299_v24 = vpop.xlane.xlu0 %1298 }
 0x459   : > { %v1320_v25 = vadd.f32 %v1504_v21, %v1299_v24 }
 0x45b   : > { %1329 = vst.msk [vmem:[%s420_s17 + $0x8] sm:$0xff] %vm1327_vm3, %v1320_v25 }
 0x45c   : > { %v1301_v26 = vpop.xlane.xlu1 %1300 }
 0x45d   : > { %v1321_v28 = vadd.f32 %v1504_v21, %v1301_v26 }
 0x45f   : > { %1330 = vst.msk [vmem:[%s420_s17 + $0x10] sm:$0xff] %vm1327_vm3, %v1321_v28 }
 0x460   : > { %v1303_v29 = vpop.xlane.xlu1 %1302 }
 0x461   : > { %v1322_v30 = vadd.f32 %v1504_v21, %v1303_v29 }
 0x463   : > { %1331 = vst.msk [vmem:[%s420_s17 + $0x18] sm:$0xff] %vm1327_vm3, %v1322_v30 }
 0x464   : > { %v1305_v31 = vpop.xlane.xlu0 %1304 }
 0x465   : > { %v1323_v27 = vadd.f32 %v1504_v21, %v1305_v31 }
 0x466   : > { %v1307_v32 = vpop.xlane.xlu1 %1306 }
 0x467   : > { %1332 = vst.msk [vmem:[%s420_s17 + $0x20] sm:$0xff] %vm1327_vm3, %v1323_v27  ;;  %v1324_v33 = vadd.f32 %v1504_v21, %v1307_v32 }
 0x469   : > { %1333 = vst.msk [vmem:[%s420_s17 + $0x28] sm:$0xff] %vm1327_vm3, %v1324_v33 }
 0x46c   : > { %v1309_v34 = vpop.xlane.xlu0 %1308 }
 0x46d   : > { %v1325_v35 = vadd.f32 %v1504_v21, %v1309_v34 }
 0x46e   : > { %v1311_v36 = vpop.xlane.xlu1 %1310 }
 0x46f   : > { %1334 = vst.msk [vmem:[%s420_s17 + $0x30] sm:$0xff] %vm1327_vm3, %v1325_v35  ;;  %v1326_v37 = vadd.f32 %v1504_v21, %v1311_v36 }
 0x471   : > { %1335 = vst.msk [vmem:[%s420_s17 + $0x38] sm:$0xff] %vm1327_vm3, %v1326_v37 }
 0x472 PF: > { %s25_s19 = sadd.s32 1, %s1764_s19  }
 0x473   : > { %p22_p2 = scmp.ge.s32.totalorder %s25_s19, 6  }
 0x475   :  { %24 = sbr.rel (!%p22_p2) target bundleno = 5 (0x5), region = 103 }
 0x47c   :  { %1358 = vsyncpa [#allocation4], 1 }
 0x47d   :  { %1360 = vsyncpa [#allocation4 + $0x1], 1 }
 0x47e   :  { %1361 = vsyncpa [#allocation6], 1 }

</bundles_post_ra>
